<compile_context>
chip_gen: v7x
topology: tpu7x:2x2x1
jax: 0.10.0
libtpu: 0.0.40
codegen_flags: <defaults>
</compile_context>

<pallas_src>
import jax
import jax.numpy as jnp
import numpy as np
from jax.experimental import pallas as pl
from jax.experimental.pallas import tpu as pltpu

_LANE = 128
_SUBLANE = 8
_NEG_MASK = -1e30  # large-negative logit mask for padded output lanes


def _round_up(a, b):
    return (a + b - 1) // b * b


def _cdiv(a, b):
    return (a + b - 1) // b


def _tpu_generation():
    """Best-effort TPU generation (5/6/7); defaults to 6-style tiling."""
    try:
        kind = jax.devices()[0].device_kind.lower()
    except Exception:
        return 6
    for g in (7, 6, 5, 4):
        if f"v{g}" in kind:
            return g
    return 6


# --------------------------------------------------------------------------
# Kernel
# --------------------------------------------------------------------------
def actor_kernel(x_ref, w1_ref, b1_ref, w2_ref, w3_ref, b3_ref, out_ref):
    """One batch tile: (block_m, 2N) -> (block_m, A_pad) softmax probs."""
    # Layer 1 (Conv1d already folded into W1_eff / b1_eff): relu(x @ W1 + b1)
    h1 = jnp.maximum(
        jnp.dot(x_ref[...], w1_ref[...], preferred_element_type=jnp.float32)
        + b1_ref[...],
        0.0)
    # Layer 2: relu(h1 @ W2)   (no bias in the module)
    h2 = jnp.maximum(
        jnp.dot(h1, w2_ref[...], preferred_element_type=jnp.float32), 0.0)
    # Layer 3: logits = h2 @ W3 + b3  (padded b3 lanes carry -1e30 -> masked out)
    logits = jnp.dot(h2, w3_ref[...],
                     preferred_element_type=jnp.float32) + b3_ref[...]
    # Per-row softmax == torch Softmax(dim=0) on each sample's 1-D output.
    m = jnp.max(logits, axis=-1, keepdims=True)
    e = jnp.exp(logits - m)
    denom = jnp.sum(e, axis=-1, keepdims=True)
    out_ref[...] = e * pl.reciprocal(denom, approx=False)


# --------------------------------------------------------------------------
# Parameter handling
# --------------------------------------------------------------------------
def init_params(key, num_inputs, hidden1, hidden2, alloc_outputs):
    """Deterministic synthetic parameters (shapes mirror the nn.Module)."""
    k = jax.random.split(key, 6)
    scale = 0.1
    cw = scale * jax.random.normal(k[0], (1, 2), jnp.float32)   # Conv1d weight (1,2,1)->(1,2)
    cb = scale * jax.random.normal(k[1], (1, 1), jnp.float32)   # Conv1d bias (1,)
    # Linear weights stored pre-transposed: (in, out)
    w1t = scale * jax.random.normal(k[2], (num_inputs, hidden1), jnp.float32)
    w2t = scale * jax.random.normal(k[3], (hidden1, hidden2), jnp.float32)
    w3t = scale * jax.random.normal(k[4], (hidden2, alloc_outputs), jnp.float32)
    b3 = scale * jax.random.normal(k[5], (1, alloc_outputs), jnp.float32)
    return cw, cb, w1t, w2t, w3t, b3


def prepare_params(raw_params, num_inputs):
    """Fold the Conv1d into Linear-1; zero-pad only weight lane dims to 128."""
    cw, cb, w1t, w2t, w3t, b3 = raw_params
    N, H1 = w1t.shape
    H2 = w2t.shape[1]
    A = w3t.shape[1]
    assert N == num_inputs

    # Fold Conv1d(2,1,1)+bias into the first Linear.
    #   v_n = cw0*x[n,0] + cw1*x[n,1] + cb ;  h1 = relu(v @ W1t)
    # becomes h1 = relu(x_flat @ W1_eff + b1_eff) with x_flat[2n+c] = x[n,c].
    cw0 = cw[0, 0]
    cw1 = cw[0, 1]
    w1_eff = jnp.stack([cw0 * w1t, cw1 * w1t], axis=1).reshape(2 * N, H1)
    b1_eff = cb[0, 0] * jnp.sum(w1t, axis=0, keepdims=True)          # (1, H1)

    # Lane-pad only the output dims of the weights; x keeps its native 2N lanes.
    H1p = _round_up(H1, _LANE)
    H2p = _round_up(H2, _LANE)
    Ap = _round_up(A, _LANE)

    f32 = jnp.float32
    w1p = jnp.zeros((2 * N, H1p), f32).at[:, :H1].set(w1_eff.astype(f32))
    b1p = jnp.zeros((1, H1p), f32).at[:, :H1].set(b1_eff.astype(f32))
    w2p = jnp.zeros((H1p, H2p), f32).at[:H1, :H2].set(w2t.astype(f32))
    w3p = jnp.zeros((H2p, Ap), f32).at[:H2, :A].set(w3t.astype(f32))
    # Padded logit lanes get -1e30 so they vanish in the softmax.
    b3p = jnp.full((1, Ap), _NEG_MASK, f32).at[:, :A].set(b3.astype(f32))

    return {
        "w1": w1p, "b1": b1p, "w2": w2p, "w3": w3p, "b3": b3p,
        "num_inputs": N, "alloc_outputs": A,
        "dims_padded": (2 * N, H1p, H2p, Ap),
    }


# --------------------------------------------------------------------------
# Tiling / VMEM sizing
# --------------------------------------------------------------------------
def _choose_block_m(m_pad8, gen):
    """Generation-aware batch tile (multiple of 8 sublanes)."""
    if gen <= 5:
        # v5e: MXU is 4x128x128; 128 rows already fills a pass.
        return min(m_pad8, 128)
    if gen >= 7:
        # v7x: keep >= 2 grid steps (when possible) so both TCs get work.
        if m_pad8 <= _SUBLANE:
            return m_pad8
        desired = 256 if m_pad8 >= 512 else 128
        half = _round_up(_cdiv(m_pad8, 2), _SUBLANE)
        return max(_SUBLANE, min(desired, half, m_pad8))
    # v6e (and unknown): 256-wide MXU, use 256-row tiles once batch allows.
    if m_pad8 >= 256:
        return 256
    return min(m_pad8, 128)


def _vmem_limit_bytes(pp, block_m, gen):
    """Size scoped VMEM from the resident weights + double-buffered I/O tiles."""
    two_n, H1p, H2p, Ap = pp["dims_padded"]
    f32 = 4
    weights = (two_n * H1p + H1p + H1p * H2p + H2p * Ap + Ap) * f32
    io_tiles = 2 * (block_m * two_n + block_m * Ap) * f32   # x/out double-buffered
    interm = block_m * (H1p + H2p + Ap) * f32               # h1/h2/logits headroom
    needed = weights + io_tiles + interm + (2 << 20)
    cap = (56 << 20) if gen >= 7 else (100 << 20)            # leave headroom on v7x
    return int(min(max(needed, 32 << 20), cap))


# --------------------------------------------------------------------------
# Pallas-backed forward
# --------------------------------------------------------------------------
def _pallas_forward(xb_flat, pp, return_padded=False):
    """xb_flat: (M, 2*num_inputs) float32 batch of flattened states."""
    M, two_n = xb_flat.shape
    IN2, H1p, H2p, Ap = pp["dims_padded"]
    assert two_n == IN2
    A = pp["alloc_outputs"]
    gen = _tpu_generation()

    # Row padding only (cheap); no lane padding of activations.
    m_pad8 = _round_up(max(M, 1), _SUBLANE)
    block_m = _choose_block_m(m_pad8, gen)
    m_pad = _round_up(m_pad8, block_m)
    grid = (m_pad // block_m,)

    x_pad = xb_flat if m_pad == M else jnp.pad(xb_flat, ((0, m_pad - M), (0, 0)))

    # Constant weight/bias slabs: whole-array VMEM residents (single copy, no
    # double-buffering, no per-step DMA).
    vmem_whole = pl.BlockSpec(memory_space=pltpu.MemorySpace.VMEM)

    out = pl.pallas_call(
        actor_kernel,
        out_shape=jax.ShapeDtypeStruct((m_pad, Ap), jnp.float32),
        grid=grid,
        in_specs=[
            pl.BlockSpec((block_m, IN2), lambda i: (i, 0)),   # x tile (pipelined)
            vmem_whole,                                       # W1_eff
            vmem_whole,                                       # b1_eff
            vmem_whole,                                       # W2
            vmem_whole,                                       # W3
            vmem_whole,                                       # b3 (+mask)
        ],
        out_specs=pl.BlockSpec((block_m, Ap), lambda i: (i, 0)),
        compiler_params=pltpu.CompilerParams(
            dimension_semantics=("parallel",),                # shard M across TCs
            vmem_limit_bytes=_vmem_limit_bytes(pp, block_m, gen)),
    )(x_pad, pp["w1"], pp["b1"], pp["w2"], pp["w3"], pp["b3"])

    if return_padded:
        return out            # (m_pad, Ap): lane-dense, rows >= M are padding
    return out[:M, :A]


def actor_net_forward(x, pp):
    """Single state, exact module semantics.

    x: any shape with numel == 2*num_inputs (matches torch.reshape(x, (-1,2,1))).
    Returns a 1-D probability vector of length alloc_outputs.
    """
    x_flat = jnp.reshape(x, (1, -1)).astype(jnp.float32)         # (1, 2N)
    assert x_flat.shape[1] == 2 * pp["num_inputs"]
    return _pallas_forward(x_flat, pp)[0]


def actor_net_forward_batch(xb, pp, return_padded=False):
    """Batched variant: xb has shape (M, 2*num_inputs).

    Each row is processed with the original per-sample semantics (softmax per
    row).  With return_padded=True the padded (m_pad, 128*k) buffer is returned
    directly, skipping the post-kernel slice copy.
    """
    xb_flat = jnp.reshape(xb, (xb.shape[0], -1)).astype(jnp.float32)
    assert xb_flat.shape[1] == 2 * pp["num_inputs"]
    return _pallas_forward(xb_flat, pp, return_padded=return_padded)


# --------------------------------------------------------------------------
# Pure-JAX reference mirroring the PyTorch module
# --------------------------------------------------------------------------
def reference_forward(x, raw_params):
    cw, cb, w1t, w2t, w3t, b3 = raw_params
    x_n2 = jnp.reshape(x, (-1, 2)).astype(jnp.float32)           # (N, 2)
    v = x_n2 @ cw[0] + cb[0, 0]                                  # Conv1d(2,1,1) -> (N,)
    h1 = jnp.maximum(v @ w1t, 0.0)
    h2 = jnp.maximum(h1 @ w2t, 0.0)
    logits = h2 @ w3t + b3[0]
    return jax.nn.softmax(logits, axis=0)


# --------------------------------------------------------------------------
# Demo / self-test
# --------------------------------------------------------------------------
if __name__ == "__main__":
    num_inputs = 32
    hidden1 = 32
    hidden2 = 32
    alloc_outputs = 8

    key = jax.random.PRNGKey(0)
    kx, kb, kc, kp = jax.random.split(key, 4)
    raw_params = init_params(kp, num_inputs, hidden1, hidden2, alloc_outputs)
    pp = prepare_params(raw_params, num_inputs)

    # --- single state (exact module semantics) -----------------------------
    x = jax.random.normal(kx, (2 * num_inputs,), jnp.float32)
    probs = actor_net_forward(x, pp)
    jax.block_until_ready(probs)

    ref = reference_forward(x, raw_params)
    np.testing.assert_allclose(np.asarray(probs), np.asarray(ref),
                               rtol=1e-5, atol=1e-6)
    assert probs.shape == (alloc_outputs,)
    np.testing.assert_allclose(float(jnp.sum(probs)), 1.0, rtol=1e-5)

    # --- small batch -------------------------------------------------------
    M = 5
    xb = jax.random.normal(kb, (M, 2 * num_inputs), jnp.float32)
    probs_b = actor_net_forward_batch(xb, pp)
    jax.block_until_ready(probs_b)
    ref_b = jnp.stack([reference_forward(xb[i], raw_params) for i in range(M)])
    np.testing.assert_allclose(np.asarray(probs_b), np.asarray(ref_b),
                               rtol=1e-5, atol=1e-6)
    assert probs_b.shape == (M, alloc_outputs)
    np.testing.assert_allclose(np.asarray(jnp.sum(probs_b, axis=-1)),
                               np.ones(M), rtol=1e-5)

    # --- larger batch (exercises >1 grid step / non-aligned rows) ----------
    M2 = 48
    xc = jax.random.normal(kc, (M2, 2 * num_inputs), jnp.float32)
    probs_c = actor_net_forward_batch(xc, pp)
    jax.block_until_ready(probs_c)
    ref_c = jnp.stack([reference_forward(xc[i], raw_params) for i in range(M2)])
    np.testing.assert_allclose(np.asarray(probs_c), np.asarray(ref_c),
                               rtol=1e-5, atol=1e-6)

    print("KERNEL_OK")
</pallas_src>

<mosaic_0001>
module attributes {stable_mosaic.version = 11 : i64} {
  func.func @actor_kernel(%arg0: i32, %arg1: memref<8x64xf32, #tpu.memory_space<vmem>>, %arg2: memref<64x128xf32, #tpu.memory_space<vmem>>, %arg3: memref<1x128xf32, #tpu.memory_space<vmem>>, %arg4: memref<128x128xf32, #tpu.memory_space<vmem>>, %arg5: memref<128x128xf32, #tpu.memory_space<vmem>>, %arg6: memref<1x128xf32, #tpu.memory_space<vmem>>, %arg7: memref<8x128xf32, #tpu.memory_space<vmem>>) attributes {dimension_semantics = [#tpu.dimension_semantics<parallel>], iteration_bounds = array<i64: 1>, scalar_prefetch = 0 : i64, scratch_operands = 0 : i64, tpu.core_type = #tpu.core_type<tc>, window_params = [{transform_indices = @transform_0, window_bounds = array<i64: 8, 64>}, {pipeline_mode = #tpu.pipeline_mode<synchronous>, transform_indices = @transform_1, window_bounds = array<i64: 64, 128>}, {pipeline_mode = #tpu.pipeline_mode<synchronous>, transform_indices = @transform_2, window_bounds = array<i64: 1, 128>}, {pipeline_mode = #tpu.pipeline_mode<synchronous>, transform_indices = @transform_3, window_bounds = array<i64: 128, 128>}, {pipeline_mode = #tpu.pipeline_mode<synchronous>, transform_indices = @transform_4, window_bounds = array<i64: 128, 128>}, {pipeline_mode = #tpu.pipeline_mode<synchronous>, transform_indices = @transform_5, window_bounds = array<i64: 1, 128>}, {transform_indices = @transform_6, window_bounds = array<i64: 8, 128>}]} {
    %c0 = arith.constant 0 : index
    %c0_0 = arith.constant 0 : index
    %0 = vector.load %arg1[%c0, %c0_0] : memref<8x64xf32, #tpu.memory_space<vmem>>, vector<8x64xf32>
    %c0_1 = arith.constant 0 : index
    %c0_2 = arith.constant 0 : index
    %1 = vector.load %arg2[%c0_1, %c0_2] : memref<64x128xf32, #tpu.memory_space<vmem>>, vector<64x128xf32>
    %cst = arith.constant dense<0.000000e+00> : vector<8x128xf32>
    %2 = tpu.matmul %0, %1, %cst {dimension_numbers = #tpu.dot_dimension_numbers<[1], [0], [0], [1], [0, 0, 1, 1], [], []>} : vector<8x64xf32>, vector<64x128xf32>, vector<8x128xf32> -> vector<8x128xf32>
    %c0_3 = arith.constant 0 : index
    %c0_4 = arith.constant 0 : index
    %3 = vector.load %arg3[%c0_3, %c0_4] : memref<1x128xf32, #tpu.memory_space<vmem>>, vector<1x128xf32>
    %4 = vector.broadcast %3 : vector<1x128xf32> to vector<8x128xf32>
    %5 = arith.addf %2, %4 : vector<8x128xf32>
    %cst_5 = arith.constant 0.000000e+00 : f32
    %6 = vector.broadcast %cst_5 : f32 to vector<8x128xf32>
    %7 = arith.maximumf %5, %6 : vector<8x128xf32>
    %c0_6 = arith.constant 0 : index
    %c0_7 = arith.constant 0 : index
    %8 = vector.load %arg4[%c0_6, %c0_7] : memref<128x128xf32, #tpu.memory_space<vmem>>, vector<128x128xf32>
    %cst_8 = arith.constant dense<0.000000e+00> : vector<8x128xf32>
    %9 = tpu.matmul %7, %8, %cst_8 {dimension_numbers = #tpu.dot_dimension_numbers<[1], [0], [0], [1], [0, 0, 1, 1], [], []>} : vector<8x128xf32>, vector<128x128xf32>, vector<8x128xf32> -> vector<8x128xf32>
    %cst_9 = arith.constant 0.000000e+00 : f32
    %10 = vector.broadcast %cst_9 : f32 to vector<8x128xf32>
    %11 = arith.maximumf %9, %10 : vector<8x128xf32>
    %c0_10 = arith.constant 0 : index
    %c0_11 = arith.constant 0 : index
    %12 = vector.load %arg5[%c0_10, %c0_11] : memref<128x128xf32, #tpu.memory_space<vmem>>, vector<128x128xf32>
    %cst_12 = arith.constant dense<0.000000e+00> : vector<8x128xf32>
    %13 = tpu.matmul %11, %12, %cst_12 {dimension_numbers = #tpu.dot_dimension_numbers<[1], [0], [0], [1], [0, 0, 1, 1], [], []>} : vector<8x128xf32>, vector<128x128xf32>, vector<8x128xf32> -> vector<8x128xf32>
    %c0_13 = arith.constant 0 : index
    %c0_14 = arith.constant 0 : index
    %14 = vector.load %arg6[%c0_13, %c0_14] : memref<1x128xf32, #tpu.memory_space<vmem>>, vector<1x128xf32>
    %15 = vector.broadcast %14 : vector<1x128xf32> to vector<8x128xf32>
    %16 = arith.addf %13, %15 : vector<8x128xf32>
    %cst_15 = arith.constant dense<0xFF800000> : vector<8xf32>
    %17 = vector.multi_reduction <maximumf>, %16, %cst_15 [1] : vector<8x128xf32> to vector<8xf32>
    %18 = vector.shape_cast %17 : vector<8xf32> to vector<8x1xf32>
    %19 = vector.broadcast %18 : vector<8x1xf32> to vector<8x128xf32>
    %20 = arith.subf %16, %19 : vector<8x128xf32>
    %21 = math.exp %20 : vector<8x128xf32>
    %cst_16 = arith.constant dense<0.000000e+00> : vector<8xf32>
    %22 = vector.multi_reduction <add>, %21, %cst_16 [1] : vector<8x128xf32> to vector<8xf32>
    %23 = vector.shape_cast %22 : vector<8xf32> to vector<8x1xf32>
    %24 = tpu.reciprocal %23 : vector<8x1xf32> -> vector<8x1xf32>
    %25 = vector.broadcast %24 : vector<8x1xf32> to vector<8x128xf32>
    %26 = arith.mulf %21, %25 : vector<8x128xf32>
    %c0_17 = arith.constant 0 : index
    %c0_18 = arith.constant 0 : index
    %27 = vector.load %arg7[%c0_17, %c0_18] : memref<8x128xf32, #tpu.memory_space<vmem>>, vector<8x128xf32>
    tpu.vector_store %arg7[%c0_17, %c0_18], %26 {strides = array<i32>} : memref<8x128xf32, #tpu.memory_space<vmem>>, vector<8x128xf32>,
    return
  }
  func.func @transform_0(%arg0: i32) -> (i32, i32) {
    %c0_i32 = arith.constant 0 : i32
    %c0_i32_0 = arith.constant 0 : i32
    return %arg0, %c0_i32 : i32, i32
  }
  func.func @transform_1(%arg0: i32) -> (i32, i32) {
    %c0_i32 = arith.constant 0 : i32
    %c0_i32_0 = arith.constant 0 : i32
    %c0_i32_1 = arith.constant 0 : i32
    return %c0_i32, %c0_i32_0 : i32, i32
  }
  func.func @transform_2(%arg0: i32) -> (i32, i32) {
    %c0_i32 = arith.constant 0 : i32
    %c0_i32_0 = arith.constant 0 : i32
    %c0_i32_1 = arith.constant 0 : i32
    return %c0_i32, %c0_i32_0 : i32, i32
  }
  func.func @transform_3(%arg0: i32) -> (i32, i32) {
    %c0_i32 = arith.constant 0 : i32
    %c0_i32_0 = arith.constant 0 : i32
    %c0_i32_1 = arith.constant 0 : i32
    return %c0_i32, %c0_i32_0 : i32, i32
  }
  func.func @transform_4(%arg0: i32) -> (i32, i32) {
    %c0_i32 = arith.constant 0 : i32
    %c0_i32_0 = arith.constant 0 : i32
    %c0_i32_1 = arith.constant 0 : i32
    return %c0_i32, %c0_i32_0 : i32, i32
  }
  func.func @transform_5(%arg0: i32) -> (i32, i32) {
    %c0_i32 = arith.constant 0 : i32
    %c0_i32_0 = arith.constant 0 : i32
    %c0_i32_1 = arith.constant 0 : i32
    return %c0_i32, %c0_i32_0 : i32, i32
  }
  func.func @transform_6(%arg0: i32) -> (i32, i32) {
    %c0_i32 = arith.constant 0 : i32
    %c0_i32_0 = arith.constant 0 : i32
    return %arg0, %c0_i32 : i32, i32
  }
}

</mosaic_0001>

<bundles_post_ra>
// kernel: tpu_custom_call.1
= control target key start
LH: loop header
LB: loop body
LE: loop exit
PB: predicated region body
PF: predicated region fallthrough
CT: control target
= control target key end

     0   :  { %11 = vsyncpa [#allocation3], 0  ;;  %s845_s0 = inlined_call_operand.hbm [shape: f32[8,64], index: 0, kind: input, shape index: {}]   ;;  %s846_s1 = inlined_call_operand.hbm [shape: f32[64,128], index: 1, kind: input, shape index: {}]   ;;  %s847_s2 = inlined_call_operand.vmem [shape: f32[1,128], index: 2, kind: input, shape index: {}]   ;;  %s848_s3 = inlined_call_operand.hbm [shape: f32[128,128], index: 3, kind: input, shape index: {}]   ;;  %s849_s4 = inlined_call_operand.hbm [shape: f32[128,128], index: 4, kind: input, shape index: {}]   ;;  %s850_s5 = inlined_call_operand.vmem [shape: f32[1,128], index: 5, kind: input, shape index: {}]   ;;  %s851_s6 = inlined_call_operand.hbm [shape: f32[8,128], index: 6, kind: output, shape index: {}]  }
   0x1   :  { %12 = vsyncpa [#allocation6], 0 }
   0x2   :  { %13 = vsyncpa [#allocation9], 0 }
   0x3   :  { %14 = vsyncpa [#allocation4], 0  ;;  %s702_s21 = smov [#allocation5]   ;;  %s584_s25 = scalar_lea.hbm %s846_s1, 1024 }
   0x4   :  { %s30_s22 = sshll.u32 %s702_s21, 4  ;;  %p585_p0 = scmp.ne.s32.totalorder %s846_s1, %s584_s25  ;;  %s31_s22 = int_to_ptr.vmem [resolvable:$true] %s30_s22 }
   0x5   :  { %p588_p1 = scmp.lt.u32.totalorder %s584_s25, %s846_s1 }
   0x7   :  { %p590_p2 = pnand %p588_p1, %p585_p0 }
   0x9   :  { %593 = shalt.err (!%p590_p2)
}
   0xa   :  { %s594_s30 = scalar_lea.vmem %s31_s22, 1024  ;;  %p599_p4 = scmp.lt.s32.totalorder %s31_s22, %s31_s22 }
   0xb   :  { %p595_p3 = scmp.ne.s32.totalorder %s31_s22, %s594_s30  ;;  %p600_p5 = scmp.lt.s32.totalorder %s594_s30, %s594_s30 }
   0xd   :  { %p601_p6 = por %p600_p5, %p599_p4 }
   0xf   :  { %p602_p7 = pnand %p601_p6, %p595_p3 }
  0x11   :  { %605 = shalt.err (!%p602_p7)
}
  0x12   :  { %s703_s7 = smov 128   ;;  %s704_s8 = smov 8  }
  0x13   :  { %36 = dma.hbm_to_vmem [thread:$0]  %s846_s1, 1024, %s31_s22, [#allocation6], %s703_s7, %s703_s7, %s704_s8  }
  0x14   :  { %s705_s11 = smov [#allocation2]   ;;  %s706_s13 = smov [#allocation7]  }
  0x15   :  { %s21_s12 = sshll.u32 %s705_s11, 4  ;;  %s44_s14 = sshll.u32 %s706_s13, 4  ;;  %s22_s12 = int_to_ptr.vmem [resolvable:$true] %s21_s12  ;;  %s45_s14 = int_to_ptr.vmem [resolvable:$true] %s44_s14 }
  0x16   :  { %s606_s17 = scalar_lea.hbm %s845_s0, 128 }
  0x17   :  { %p607_p8 = scmp.ne.s32.totalorder %s845_s0, %s606_s17  ;;  %p610_p9 = scmp.lt.u32.totalorder %s606_s17, %s845_s0 }
  0x19   :  { %p612_p10 = pnand %p610_p9, %p607_p8 }
  0x1b   :  { %615 = shalt.err (!%p612_p10)
}
  0x1c   :  { %s616_s1 = scalar_lea.vmem %s22_s12, 128  ;;  %p621_p12 = scmp.lt.s32.totalorder %s22_s12, %s22_s12 }
  0x1d   :  { %p617_p11 = scmp.ne.s32.totalorder %s22_s12, %s616_s1  ;;  %p622_p13 = scmp.lt.s32.totalorder %s616_s1, %s616_s1 }
  0x1f   :  { %p623_p0 = por %p622_p13, %p621_p12 }
  0x21   :  { %p624_p1 = pnand %p623_p0, %p617_p11 }
  0x23   :  { %627 = shalt.err (!%p624_p1)
}
  0x24   :  { %24 = dma.hbm_to_vmem [thread:$0]  %s845_s0, 128, %s22_s12, [#allocation3]  }
  0x25   :  { %s628_s26 = scalar_lea.hbm %s848_s3, 2048 }
  0x26   :  { %p629_p2 = scmp.ne.s32.totalorder %s848_s3, %s628_s26  ;;  %p632_p3 = scmp.lt.u32.totalorder %s628_s26, %s848_s3 }
  0x28   :  { %p634_p4 = pnand %p632_p3, %p629_p2 }
  0x2a   :  { %637 = shalt.err (!%p634_p4)
}
  0x2b   :  { %s638_s9 = scalar_lea.vmem %s45_s14, 2048  ;;  %p643_p6 = scmp.lt.s32.totalorder %s45_s14, %s45_s14 }
  0x2c   :  { %p639_p5 = scmp.ne.s32.totalorder %s45_s14, %s638_s9  ;;  %p644_p7 = scmp.lt.s32.totalorder %s638_s9, %s638_s9 }
  0x2e   :  { %p645_p8 = por %p644_p7, %p643_p6 }
  0x30   :  { %p646_p9 = pnand %p645_p8, %p639_p5 }
  0x32   :  { %649 = shalt.err (!%p646_p9)
}
  0x33   :  { %50 = dma.hbm_to_vmem [thread:$0]  %s848_s3, 2048, %s45_s14, [#allocation6], %s703_s7, %s703_s7, %s704_s8  }
  0x34   :  { %s707_s11 = smov [#allocation8]   ;;  %s650_s16 = scalar_lea.hbm %s849_s4, 2048 }
  0x35   :  { %s56_s12 = sshll.u32 %s707_s11, 4  ;;  %p651_p10 = scmp.ne.s32.totalorder %s849_s4, %s650_s16  ;;  %s57_s12 = int_to_ptr.vmem [resolvable:$true] %s56_s12 }
  0x36   :  { %p654_p11 = scmp.lt.u32.totalorder %s650_s16, %s849_s4 }
  0x38   :  { %p656_p12 = pnand %p654_p11, %p651_p10 }
  0x3a   :  { %659 = shalt.err (!%p656_p12)
}
  0x3b   :  { %s660_s21 = scalar_lea.vmem %s57_s12, 2048  ;;  %p665_p0 = scmp.lt.s32.totalorder %s57_s12, %s57_s12 }
  0x3c   :  { %p661_p13 = scmp.ne.s32.totalorder %s57_s12, %s660_s21  ;;  %p666_p1 = scmp.lt.s32.totalorder %s660_s21, %s660_s21 }
  0x3e   :  { %p667_p2 = por %p666_p1, %p665_p0 }
  0x40   :  { %p668_p3 = pnand %p667_p2, %p661_p13 }
  0x42   :  { %671 = shalt.err (!%p668_p3)
}
  0x43   :  { %62 = dma.hbm_to_vmem [thread:$0]  %s849_s4, 2048, %s57_s12, [#allocation9], %s703_s7, %s703_s7, %s704_s8  }
  0x44   :  { %694 = dma.done.wait [#allocation3], 128  }
  0x45   :  { %695 = vsyncadd [#allocation3], 4294967168 }
  0x46   :  { %696 = dma.done.wait [#allocation6], 3072  }
  0x47   :  { %697 = vsyncadd [#allocation6], 4294964224 }
  0x48   :  { %698 = dma.done.wait [#allocation9], 2048  }
  0x49   :  { %699 = vsyncadd [#allocation9], 4294965248  ;;  %v708_v0 = vmov 0.0|0.0   ;;  %vm709_vm0 = vmmov 0   ;;  %v710_v1 = vmov 0.0   ;;  %v78_v2 = vld [vmem:[#allocation5] sm:$0xff] }
  0x4a   :  { %510 = vmatprep.subr.bf16.mxu0 %v708_v0  ;;  %437 = vmatprep.mubr.msk.f32.mxu0 %vm709_vm0, %v710_v1  ;;  %v79_v3 = vld [vmem:[#allocation5 + $0x8] sm:$0xff]  ;;  %v80_v4 = vld [vmem:[#allocation5 + $0x10] sm:$0xff]  ;;  %v81_v6 = vld [vmem:[#allocation5 + $0x18] sm:$0xff]  ;;  %vm93_vm1 = vcmask 523264  }
  0x4b   :  { %522 = vmatprep.subr.bf16.mxu1 %v708_v0  ;;  %472 = vmatprep.mubr.msk.f32.mxu1 %vm709_vm0, %v710_v1  ;;  %v511_v5 = vpack.c.bf16 %v79_v3, %v78_v2  ;;  %v514_v7 = vpack.c.bf16 %v81_v6, %v80_v4  ;;  %v168_v8 = vld [vmem:[#allocation7] sm:$0xff]  ;;  %v169_v9 = vld [vmem:[#allocation7 + $0x8] sm:$0xff]  ;;  %v170_v10 = vld [vmem:[#allocation7 + $0x10] sm:$0xff] }
  0x4c   :  { %v82_v11 = vld [vmem:[#allocation5 + $0x20] sm:$0xff]  ;;  %v83_v12 = vld [vmem:[#allocation5 + $0x28] sm:$0xff]  ;;  %v523_v13 = vpack.c.bf16 %v169_v9, %v168_v8  ;;  %v171_v14 = vld [vmem:[#allocation7 + $0x18] sm:$0xff] }
  0x4d   :  { %512 = vmatpush3.bf16.msra.mxu0 %v511_v5  ;;  %v526_v15 = vpack.c.bf16 %v171_v14, %v170_v10  ;;  %v517_v16 = vpack.c.bf16 %v83_v12, %v82_v11  ;;  %v172_v17 = vld [vmem:[#allocation7 + $0x20] sm:$0xff]  ;;  %v173_v18 = vld [vmem:[#allocation7 + $0x28] sm:$0xff]  ;;  %v84_v19 = vld [vmem:[#allocation5 + $0x30] sm:$0xff] }
  0x4e   :  { %513 = vmatprep.subr.bf16.mxu0 %v708_v0  ;;  %524 = vmatpush3.bf16.msra.mxu1 %v523_v13  ;;  %v85_v20 = vld [vmem:[#allocation5 + $0x38] sm:$0xff]  ;;  %v529_v21 = vpack.c.bf16 %v173_v18, %v172_v17  ;;  %v174_v23 = vld [vmem:[#allocation7 + $0x30] sm:$0xff]  ;;  %v176_v27 = vld [vmem:[#allocation7 + $0x40] sm:$0xff] }
  0x4f   :  { %525 = vmatprep.subr.bf16.mxu1 %v708_v0  ;;  %v520_v22 = vpack.c.bf16 %v85_v20, %v84_v19  ;;  %v175_v24 = vld [vmem:[#allocation7 + $0x38] sm:$0xff]  ;;  %v177_v28 = vld [vmem:[#allocation7 + $0x48] sm:$0xff]  ;;  %v178_v30 = vld [vmem:[#allocation7 + $0x50] sm:$0xff] }
  0x50   :  { %v532_v25 = vpack.c.bf16 %v175_v24, %v174_v23  ;;  %v77_v26 = vld [vmem:[#allocation2] sm:$0xff]  ;;  %v535_v29 = vpack.c.bf16 %v177_v28, %v176_v27  ;;  %v180_v33 = vld [vmem:[#allocation7 + $0x60] sm:$0xff]  ;;  %v181_v34 = vld [vmem:[#allocation7 + $0x68] sm:$0xff] }
  0x51   :  { %515 = vmatpush3.bf16.msra.mxu0 %v514_v7  ;;  %v179_v31 = vld [vmem:[#allocation7 + $0x58] sm:$0xff]  ;;  %v541_v35 = vpack.c.bf16 %v181_v34, %v180_v33  ;;  %v182_v36 = vld [vmem:[#allocation7 + $0x70] sm:$0xff]  ;;  %v255_v39 = vld [vmem:[#allocation8] sm:$0xff] }
  0x52   :  { %516 = vmatprep.subr.bf16.mxu0 %v708_v0  ;;  %527 = vmatpush3.bf16.msra.mxu1 %v526_v15  ;;  %v538_v32 = vpack.c.bf16 %v179_v31, %v178_v30  ;;  %v183_v37 = vld [vmem:[#allocation7 + $0x78] sm:$0xff]  ;;  %v256_v40 = vld [vmem:[#allocation8 + $0x8] sm:$0xff]  ;;  %v257_v41 = vld [vmem:[#allocation8 + $0x10] sm:$0xff] }
  0x53   :  { %528 = vmatprep.subr.bf16.mxu1 %v708_v0  ;;  %v544_v38 = vpack.c.bf16 %v183_v37, %v182_v36  ;;  %v547_v42 = vpack.c.bf16 %v256_v40, %v255_v39  ;;  %v258_v43 = vld [vmem:[#allocation8 + $0x18] sm:$0xff]  ;;  %v259_v45 = vld [vmem:[#allocation8 + $0x20] sm:$0xff]  ;;  %v260_v46 = vld [vmem:[#allocation8 + $0x28] sm:$0xff] }
  0x54   :  { %v550_v44 = vpack.c.bf16 %v258_v43, %v257_v41  ;;  %v553_v47 = vpack.c.bf16 %v260_v46, %v259_v45  ;;  %v261_v48 = vld [vmem:[#allocation8 + $0x30] sm:$0xff]  ;;  %v262_v49 = vld [vmem:[#allocation8 + $0x38] sm:$0xff]  ;;  %v263_v51 = vld [vmem:[#allocation8 + $0x40] sm:$0xff] }
  0x55   :  { %518 = vmatpush3.bf16.msra.mxu0 %v517_v16  ;;  %v556_v50 = vpack.c.bf16 %v262_v49, %v261_v48  ;;  %v264_v52 = vld [vmem:[#allocation8 + $0x48] sm:$0xff]  ;;  %v265_v54 = vld [vmem:[#allocation8 + $0x50] sm:$0xff]  ;;  %v266_v55 = vld [vmem:[#allocation8 + $0x58] sm:$0xff] }
  0x56   :  { %519 = vmatprep.subr.bf16.mxu0 %v708_v0  ;;  %530 = vmatpush3.bf16.msra.mxu1 %v529_v21  ;;  %v559_v53 = vpack.c.bf16 %v264_v52, %v263_v51  ;;  %v562_v56 = vpack.c.bf16 %v266_v55, %v265_v54  ;;  %v267_v57 = vld [vmem:[#allocation8 + $0x60] sm:$0xff]  ;;  %v268_v58 = vld [vmem:[#allocation8 + $0x68] sm:$0xff]  ;;  %v375_v60 = vld [vmem:[%s847_s2] ss:$0 sm:$0xff]  ;;  %s711_s2 = smov [#allocation10]  }
  0x57   :  { %531 = vmatprep.subr.bf16.mxu1 %v708_v0  ;;  %v565_v59 = vpack.c.bf16 %v268_v58, %v267_v57  ;;  %v269_v2 = vld [vmem:[#allocation8 + $0x70] sm:$0xff]  ;;  %v270_v3 = vld [vmem:[#allocation8 + $0x78] sm:$0xff]  ;;  %s364_s22 = sshll.u32 %s711_s2, 4  ;;  %s365_s22 = int_to_ptr.vmem [resolvable:$true] %s364_s22 }
  0x58   :  { %v568_v4 = vpack.c.bf16 %v270_v3, %v269_v2  ;;  %s672_s23 = scalar_lea.vmem %s365_s22, 128  ;;  %p677_p5 = scmp.lt.s32.totalorder %s365_s22, %s365_s22 }
  0x59   :  { %521 = vmatpush3.bf16.msra.mxu0 %v520_v22  ;;  %p673_p4 = scmp.ne.s32.totalorder %s365_s22, %s672_s23  ;;  %p678_p6 = scmp.lt.s32.totalorder %s672_s23, %s672_s23 }
  0x5a   :  { %546 = vmatprep.subr.bf16.mxu0 %v708_v0  ;;  %533 = vmatpush3.bf16.msra.mxu1 %v532_v25 }
  0x5b   :  { %534 = vmatprep.subr.bf16.mxu1 %v708_v0  ;;  %p679_p7 = por %p678_p6, %p677_p5 }
  0x5c   :  { %438 = vmatmul.mubr.msk.f32.vlgmr.msra.gmra.mrb[0].mxu0 %vm93_vm1, %v77_v26 }
  0x5d   :  { %507 = vmatprep.mubr.msk.f32.mxu0 %vm709_vm0, %v710_v1  ;;  %548 = vmatpush3.bf16.msra.mxu0 %v547_v42  ;;  %p680_p8 = pnand %p679_p7, %p673_p4 }
  0x5e   :  { %536 = vmatpush3.bf16.msra.mxu1 %v535_v29  ;;  %549 = vmatprep.subr.bf16.mxu0 %v708_v0 }
  0x5f   :  { %537 = vmatprep.subr.bf16.mxu1 %v708_v0 }
  0x61   :  { %551 = vmatpush3.bf16.msra.mxu0 %v550_v44 }
  0x62   :  { %539 = vmatpush3.bf16.msra.mxu1 %v538_v32  ;;  %552 = vmatprep.subr.bf16.mxu0 %v708_v0 }
  0x63   :  { %540 = vmatprep.subr.bf16.mxu1 %v708_v0 }
  0x65   :  { %554 = vmatpush3.bf16.msra.mxu0 %v553_v47 }
  0x66   :  { %542 = vmatpush3.bf16.msra.mxu1 %v541_v35  ;;  %555 = vmatprep.subr.bf16.mxu0 %v708_v0 }
  0x67   :  { %543 = vmatprep.subr.bf16.mxu1 %v708_v0 }
  0x69   :  { %557 = vmatpush3.bf16.msra.mxu0 %v556_v50 }
  0x6a   :  { %545 = vmatpush3.bf16.msra.mxu1 %v544_v38  ;;  %558 = vmatprep.subr.bf16.mxu0 %v708_v0 }
  0x6d   :  { %560 = vmatpush3.bf16.msra.mxu0 %v559_v53 }
  0x6e   :  { %561 = vmatprep.subr.bf16.mxu0 %v708_v0 }
  0x71   :  { %563 = vmatpush3.bf16.msra.mxu0 %v562_v56 }
  0x72   :  { %564 = vmatprep.subr.bf16.mxu0 %v708_v0 }
  0x75   :  { %566 = vmatpush3.bf16.msra.mxu0 %v565_v59 }
  0x76   :  { %567 = vmatprep.subr.bf16.mxu0 %v708_v0  ;;  %v377_v0 = vld [vmem:[%s850_s5] ss:$0 sm:$0xff] }
  0x79   :  { %569 = vmatpush3.bf16.msra.mxu0 %v568_v4 }
 0x12f   :  { %v163_v61 = vpop.f32.mrb[0].mxu0 }
 0x130   :  { %v164_v62 = vadd.f32 %v375_v60, %v163_v61  ;;  %v439_v63 = vpop.f32.mrb[1].mxu0 }
 0x132   :  { %v167_v1 = vmax.f32 %v164_v62, 0.0 }
 0x134   :  { %473 = vmatmul.mubr.f32.vlgmr.msra.gmra.mrb[0].mxu1 %v167_v1 }
 0x207   :  { %v250_v5 = vpop.f32.mrb[0].mxu1 }
 0x208   :  { %v254_v6 = vmax.f32 %v250_v5, 0.0  ;;  %v474_v7 = vpop.f32.mrb[1].mxu1 }
 0x20a   :  { %508 = vmatmul.mubr.f32.vlgmr.msra.gmra.mrb[2].mxu0 %v254_v6 }
 0x2dd   :  { %v344_v8 = vpop.f32.mrb[2].mxu0 }
 0x2de   :  { %v345_v9 = vadd.f32 %v377_v0, %v344_v8  ;;  %v509_v10 = vpop.f32.mrb[3].mxu0 }
 0x2e0   :  { %348 = vmax.xlane.f32.xlu0 %v345_v9 }
 0x36d   :  { %v349_v11 = vpop.xlane.xlu0 %348 }
 0x36e   :  { %v350_v12 = vsub.f32 %v345_v9, %v349_v11 }
 0x370   :  { %v351_v13 = vmul.f32 1.442695, %v350_v12 }
 0x372   :  { %580 = vpow2.f32 %v351_v13 }
 0x37c   :  { %v581_v14 = vpop.eup %580 }
 0x37d   :  { %353 = vadd.xlane.f32.xlu0 %v581_v14 }
 0x40a   :  { %v354_v15 = vpop.xlane.xlu0 %353 }
 0x40b   :  { %582 = vrcp.f32 %v354_v15 }
 0x415   :  { %v583_v16 = vpop.eup %582 }
 0x416   :  { %v356_v17 = vmul.f32 %v583_v16, %v581_v14 }
 0x418   :  { %357 = vst [vmem:[#allocation10] sm:$0xff] %v356_v17 }
 0x419   :  { %683 = shalt.err (!%p680_p8)
}
 0x41a   :  { %s684_s25 = scalar_lea.hbm %s851_s6, 128 }
 0x41b   :  { %p685_p9 = scmp.ne.s32.totalorder %s851_s6, %s684_s25  ;;  %p688_p10 = scmp.lt.u32.totalorder %s684_s25, %s851_s6 }
 0x41d   :  { %p690_p11 = pnand %p688_p10, %p685_p9 }
 0x41f   :  { %693 = shalt.err (!%p690_p11)
}
 0x420   :  { %367 = dma.vmem_to_hbm [thread:$0]  %s365_s22, 128, %s851_s6, [#allocation4]  }
 0x421   :  { %700 = dma.done.wait [#allocation4], 128  }
 0x422   :  { %701 = vsyncadd [#allocation4], 4294967168 }
 0x423   :  { %371 = vsyncpa [#allocation3], 1 }
 0x424   :  { %372 = vsyncpa [#allocation6], 1 }
 0x425   :  { %373 = vsyncpa [#allocation9], 1 }
 0x426   :  { %374 = vsyncpa [#allocation4], 1 }

</bundles_post_ra>
